<compile_context>
chip_gen: v5e
topology: v5e:2x2
jax: 0.10.0
libtpu: 0.0.40
codegen_flags: <defaults>
</compile_context>

<pallas_src>
import functools

import numpy as np
import jax
import jax.numpy as jnp
from jax import lax
from jax.experimental import pallas as pl
from jax.experimental.pallas import tpu as pltpu


_BN_EPS = 1e-5
_SCALES = (1, 2, 4, 8)


# ------------------------------ fused kernel --------------------------------

def _fused_kernel(*refs, n_branch, oc_pad, row_off, ksize, w_pad):
    xs_refs = refs[:n_branch]
    wb_refs = refs[n_branch:2 * n_branch]
    u_refs = refs[2 * n_branch:3 * n_branch]
    bb_ref, fwf_ref, fb_ref, o_ref = refs[3 * n_branch:]

    B = o_ref.shape[0]
    W = o_ref.shape[-1]
    fb = fb_ref[...]                                   # (out_ch, 1) f32

    # ---- Stage 1: branch convs at native width (+ bias + ReLU), then MXU
    #      upsample-and-place into the per-batch zero-padded slab layout. ----
    pieces = []
    for i in range(n_branch):
        y = jnp.dot(wb_refs[i][...], xs_refs[i][...],
                    preferred_element_type=jnp.float32)        # (ocp_i, B*w_i)
        bias_i = bb_ref[row_off[i]:row_off[i] + oc_pad[i], :]  # (ocp_i, 1) f32
        f = jnp.maximum(y + bias_i, 0.0)
        pieces.append(
            jnp.dot(f.astype(jnp.bfloat16), u_refs[i][...],
                    preferred_element_type=jnp.float32))       # (ocp_i, B*Wp)
    # 8-aligned sublane concat of the branch row bands.
    feat = jnp.concatenate(pieces, axis=0).astype(jnp.bfloat16)  # (C_pad, B*Wp)

    # ---- Stage 2: (1, 9) fuse conv as 9 accumulating matmuls on static lane
    #      slices of the zero-padded feature (no im2col materialisation). ----
    wc = B * w_pad - (ksize - 1)
    acc = jnp.dot(fwf_ref[0], feat[:, 0:wc],
                  preferred_element_type=jnp.float32)            # (out_ch, wc)
    for t in range(1, ksize):
        acc = acc + jnp.dot(fwf_ref[t], feat[:, t:t + wc],
                            preferred_element_type=jnp.float32)

    # ---- Stage 3: bias + ReLU epilogue; one slab store per batch element. --
    for b in range(B):
        o_ref[b] = jnp.maximum(acc[:, b * w_pad:b * w_pad + W] + fb, 0.0)


# ------------------------------- host helpers --------------------------------

def _upsample_place_matrix(w_native, scale, batch, w_pad, pad):
    """(B*w_native, B*w_pad) 0/1 matrix: nearest-upsample columns by `scale`
    and place each batch's columns into its own zero-padded slab."""
    u = np.zeros((batch * w_native, batch * w_pad), np.float32)
    for b in range(batch):
        for wn in range(w_native):
            lo = b * w_pad + pad + wn * scale
            u[b * w_native + wn, lo:lo + scale] = 1.0
    return jnp.asarray(u, jnp.bfloat16)


def _full_spec(shape):
    zeros = (0,) * len(shape)
    return pl.BlockSpec(tuple(shape), lambda i, _z=zeros: _z)


def simple_reduction_forward(packed, conv_list):
    scales = packed["scales"]
    ksize = packed["ksize"]
    pad = (ksize - 1) // 2
    assert len(conv_list) == len(scales)

    B = conv_list[0].shape[0]
    W = conv_list[0].shape[-1] * scales[0]
    assert all(x.shape[-1] * s == W for x, s in zip(conv_list, scales))
    w_pad = W + 2 * pad                     # per-batch slab width in feat

    # (B, C, H, Wn) -> (C*H, B*Wn): batch packed into the lane axis, bf16 MXU
    # operands (f32 accumulate happens in-kernel).
    xs_list = []
    for x in conv_list:
        b, c, h, w = x.shape
        xs = x.reshape(b, c * h, w).transpose(1, 0, 2).reshape(c * h, b * w)
        xs_list.append(xs.astype(jnp.bfloat16))

    # Host-precomputed 0/1 upsample-and-place matrices (tiny VMEM inputs).
    u_list = [_upsample_place_matrix(x.shape[-1], s, B, w_pad, pad)
              for x, s in zip(conv_list, scales)]

    wbs, bb, fwf, fb = packed["wbs"], packed["bb"], packed["fwf"], packed["fb"]
    out_ch = fb.shape[0]

    kernel = functools.partial(
        _fused_kernel, n_branch=len(xs_list), oc_pad=packed["oc_pad"],
        row_off=packed["row_off"], ksize=ksize, w_pad=w_pad)

    operands = list(xs_list) + list(wbs) + list(u_list) + [bb, fwf, fb]
    in_specs = [_full_spec(op.shape) for op in operands]

    out = pl.pallas_call(
        kernel,
        out_shape=jax.ShapeDtypeStruct((B, out_ch, W), jnp.float32),
        grid_spec=pltpu.PrefetchScalarGridSpec(
            num_scalar_prefetch=0,
            grid=(1,),
            in_specs=in_specs,
            out_specs=_full_spec((B, out_ch, W)),
        ),
        # Microscopic, latency-bound workload: keep it on one core.
        compiler_params=pltpu.CompilerParams(dimension_semantics=("arbitrary",)),
    )(*operands)
    return {"1D": out}


# ------------------------- module parameters / packing -----------------------

def _fold_bn(gamma, beta, mean, var):
    scale = gamma / jnp.sqrt(var + _BN_EPS)
    bias = beta - mean * scale
    return scale[:, None].astype(jnp.float32), bias[:, None].astype(jnp.float32)


def init_simple_reduction(key, cs, heights, out_ch=64):
    """Deterministic synthetic parameters matching the PyTorch module shapes."""
    params = {"branches": [], "out_ch": out_ch}
    for i, (c, h) in enumerate(zip(cs, heights)):
        k = jax.random.fold_in(key, i)
        kw, kg, kb, km, kv = jax.random.split(k, 5)
        oc = c // 4
        w = jax.random.normal(kw, (oc, c, h, 1), jnp.float32) * 0.05   # Conv2d(c, c//4, (h,1))
        gamma = 1.0 + 0.1 * jax.random.normal(kg, (oc,), jnp.float32)
        beta = 0.05 * jax.random.normal(kb, (oc,), jnp.float32)
        mean = 0.05 * jax.random.normal(km, (oc,), jnp.float32)
        var = 1.0 + 0.1 * jax.random.uniform(kv, (oc,), jnp.float32)
        params["branches"].append((w, _fold_bn(gamma, beta, mean, var)))
    kf = jax.random.fold_in(key, 100)
    kw, kg, kb, km, kv = jax.random.split(kf, 5)
    c_tot = sum(cs) // 4
    fw = jax.random.normal(kw, (out_ch, c_tot, 1, 9), jnp.float32) * 0.05  # Conv2d(c_tot, out_ch, (1,9))
    gamma = 1.0 + 0.1 * jax.random.normal(kg, (out_ch,), jnp.float32)
    beta = 0.05 * jax.random.normal(kb, (out_ch,), jnp.float32)
    mean = 0.05 * jax.random.normal(km, (out_ch,), jnp.float32)
    var = 1.0 + 0.1 * jax.random.uniform(kv, (out_ch,), jnp.float32)
    params["fuse"] = (fw, _fold_bn(gamma, beta, mean, var))
    return params


def pack_simple_reduction(params, cs, heights, scales=_SCALES):
    """Fold eval-mode BN into the conv weights, pad each branch's output
    channels to an 8-aligned row band, and lay out the fuse weight per tap
    over the padded channel rows.  MXU operands are stored bf16; biases f32."""
    o_sizes = [c // 4 for c in cs]
    oc_pad = [((oc + 7) // 8) * 8 for oc in o_sizes]
    row_off = [0]
    for p in oc_pad[:-1]:
        row_off.append(row_off[-1] + p)
    c_pad = sum(oc_pad)

    wbs = []
    bb = np.zeros((c_pad, 1), np.float32)
    for (w, (scale, bias)), oc, ocp, off, c, h in zip(
            params["branches"], o_sizes, oc_pad, row_off, cs, heights):
        w_flat = np.asarray(scale) * np.asarray(w[..., 0].reshape(oc, c * h))
        wb = np.zeros((ocp, c * h), np.float32)
        wb[:oc] = w_flat                              # zero rows at channel pad
        wbs.append(jnp.asarray(wb, jnp.bfloat16))
        bb[off:off + oc] = np.asarray(bias)

    fw, (fscale, fbias) = params["fuse"]
    out_ch, c_tot, _, ksize = fw.shape
    fw2 = np.asarray(fw[:, :, 0, :] * fscale[:, :, None])   # (out_ch, c_tot, k)
    fwf = np.zeros((ksize, out_ch, c_pad), np.float32)
    src = 0
    for oc, off in zip(o_sizes, row_off):
        for t in range(ksize):
            fwf[t, :, off:off + oc] = fw2[:, src:src + oc, t]
        src += oc

    return {"wbs": wbs,
            "bb": jnp.asarray(bb),
            "fwf": jnp.asarray(fwf, jnp.bfloat16),
            "fb": jnp.asarray(fbias, jnp.float32),
            "oc_pad": tuple(oc_pad),
            "row_off": tuple(row_off),
            "ksize": int(ksize),
            "scales": tuple(scales)}


# ----------------------------- pure-JAX reference ----------------------------

def reference_forward(params, conv_list):
    feats = []
    for (w, (scale, bias)), x, s in zip(params["branches"], conv_list, _SCALES):
        xu = jnp.repeat(x, s, axis=-1) if s > 1 else x
        y = jnp.einsum("och,bchw->bow", w[..., 0], xu,
                       precision=lax.Precision.HIGHEST)
        feats.append(jnp.maximum(y * scale + bias, 0.0))
    feat = jnp.concatenate(feats, axis=1)
    fw, (fscale, fbias) = params["fuse"]
    fw2 = fw[:, :, 0, :]
    B, C, W = feat.shape
    fp = jnp.pad(feat, ((0, 0), (0, 0), (4, 4)))
    acc = jnp.zeros((B, fw2.shape[0], W), jnp.float32)
    for t in range(9):
        acc = acc + jnp.einsum("oc,bcw->bow", fw2[:, :, t], fp[:, :, t:t + W],
                               precision=lax.Precision.HIGHEST)
    return {"1D": jnp.maximum(acc * fscale + fbias, 0.0)}


# ---------------------------------- main --------------------------------------

if __name__ == "__main__":
    key = jax.random.PRNGKey(0)
    cs = (16, 32, 64, 128)
    heights = (8, 4, 2, 2)
    widths = (16, 8, 4, 2)
    out_ch = 32
    B = 2

    params = init_simple_reduction(jax.random.fold_in(key, 7), cs, heights, out_ch)
    packed = pack_simple_reduction(params, cs, heights)

    conv_list = []
    for i, (c, h, w) in enumerate(zip(cs, heights, widths)):
        conv_list.append(jax.random.normal(
            jax.random.fold_in(key, 1000 + i), (B, c, h, w), jnp.float32))

    out = simple_reduction_forward(packed, conv_list)
    jax.block_until_ready(out["1D"])

    ref = reference_forward(params, conv_list)
    assert out["1D"].shape == (B, out_ch, widths[0] * _SCALES[0])   # (2, 32, 16)
    assert jnp.all(jnp.isfinite(out["1D"]))
    assert jnp.allclose(out["1D"], ref["1D"], rtol=2e-2, atol=2e-2), "mismatch vs reference"

    print("KERNEL_OK")
</pallas_src>

<mosaic_0001>
module attributes {stable_mosaic.version = 11 : i64} {
  func.func @_fused_kernel(%arg0: i32, %arg1: memref<128x32xbf16, #tpu.memory_space<vmem>>, %arg2: memref<128x16xbf16, #tpu.memory_space<vmem>>, %arg3: memref<128x8xbf16, #tpu.memory_space<vmem>>, %arg4: memref<256x4xbf16, #tpu.memory_space<vmem>>, %arg5: memref<8x128xbf16, #tpu.memory_space<vmem>>, %arg6: memref<8x128xbf16, #tpu.memory_space<vmem>>, %arg7: memref<16x128xbf16, #tpu.memory_space<vmem>>, %arg8: memref<32x256xbf16, #tpu.memory_space<vmem>>, %arg9: memref<32x48xbf16, #tpu.memory_space<vmem>>, %arg10: memref<16x48xbf16, #tpu.memory_space<vmem>>, %arg11: memref<8x48xbf16, #tpu.memory_space<vmem>>, %arg12: memref<4x48xbf16, #tpu.memory_space<vmem>>, %arg13: memref<64x1xf32, #tpu.memory_space<vmem>>, %arg14: memref<9x32x64xbf16, #tpu.memory_space<vmem>>, %arg15: memref<32x1xf32, #tpu.memory_space<vmem>>, %arg16: memref<2x32x16xf32, #tpu.memory_space<vmem>>) attributes {dimension_semantics = [#tpu.dimension_semantics<arbitrary>], iteration_bounds = array<i64: 1>, scalar_prefetch = 0 : i64, scratch_operands = 0 : i64, tpu.core_type = #tpu.core_type<tc>, window_params = [{pipeline_mode = #tpu.pipeline_mode<synchronous>, transform_indices = @transform_0, window_bounds = array<i64: 128, 32>}, {pipeline_mode = #tpu.pipeline_mode<synchronous>, transform_indices = @transform_1, window_bounds = array<i64: 128, 16>}, {pipeline_mode = #tpu.pipeline_mode<synchronous>, transform_indices = @transform_2, window_bounds = array<i64: 128, 8>}, {pipeline_mode = #tpu.pipeline_mode<synchronous>, transform_indices = @transform_3, window_bounds = array<i64: 256, 4>}, {pipeline_mode = #tpu.pipeline_mode<synchronous>, transform_indices = @transform_4, window_bounds = array<i64: 8, 128>}, {pipeline_mode = #tpu.pipeline_mode<synchronous>, transform_indices = @transform_5, window_bounds = array<i64: 8, 128>}, {pipeline_mode = #tpu.pipeline_mode<synchronous>, transform_indices = @transform_6, window_bounds = array<i64: 16, 128>}, {pipeline_mode = #tpu.pipeline_mode<synchronous>, transform_indices = @transform_7, window_bounds = array<i64: 32, 256>}, {pipeline_mode = #tpu.pipeline_mode<synchronous>, transform_indices = @transform_8, window_bounds = array<i64: 32, 48>}, {pipeline_mode = #tpu.pipeline_mode<synchronous>, transform_indices = @transform_9, window_bounds = array<i64: 16, 48>}, {pipeline_mode = #tpu.pipeline_mode<synchronous>, transform_indices = @transform_10, window_bounds = array<i64: 8, 48>}, {pipeline_mode = #tpu.pipeline_mode<synchronous>, transform_indices = @transform_11, window_bounds = array<i64: 4, 48>}, {pipeline_mode = #tpu.pipeline_mode<synchronous>, transform_indices = @transform_12, window_bounds = array<i64: 64, 1>}, {pipeline_mode = #tpu.pipeline_mode<synchronous>, transform_indices = @transform_13, window_bounds = array<i64: 9, 32, 64>}, {pipeline_mode = #tpu.pipeline_mode<synchronous>, transform_indices = @transform_14, window_bounds = array<i64: 32, 1>}, {pipeline_mode = #tpu.pipeline_mode<synchronous>, transform_indices = @transform_15, window_bounds = array<i64: 2, 32, 16>}]} {
    %c0 = arith.constant 0 : index
    %c0_0 = arith.constant 0 : index
    %0 = vector.load %arg15[%c0, %c0_0] : memref<32x1xf32, #tpu.memory_space<vmem>>, vector<32x1xf32>
    %c0_1 = arith.constant 0 : index
    %c0_2 = arith.constant 0 : index
    %1 = vector.load %arg5[%c0_1, %c0_2] : memref<8x128xbf16, #tpu.memory_space<vmem>>, vector<8x128xbf16>
    %c0_3 = arith.constant 0 : index
    %c0_4 = arith.constant 0 : index
    %2 = vector.load %arg1[%c0_3, %c0_4] : memref<128x32xbf16, #tpu.memory_space<vmem>>, vector<128x32xbf16>
    %cst = arith.constant dense<0.000000e+00> : vector<8x32xf32>
    %3 = tpu.matmul %1, %2, %cst {dimension_numbers = #tpu.dot_dimension_numbers<[1], [0], [0], [1], [0, 0, 1, 1], [], []>} : vector<8x128xbf16>, vector<128x32xbf16>, vector<8x32xf32> -> vector<8x32xf32>
    %c0_5 = arith.constant 0 : index
    %c0_6 = arith.constant 0 : index
    %4 = vector.load %arg13[%c0_5, %c0_6] : memref<64x1xf32, #tpu.memory_space<vmem>>, vector<8x1xf32>
    %5 = vector.broadcast %4 : vector<8x1xf32> to vector<8x32xf32>
    %6 = arith.addf %3, %5 : vector<8x32xf32>
    %cst_7 = arith.constant 0.000000e+00 : f32
    %7 = vector.broadcast %cst_7 : f32 to vector<8x32xf32>
    %8 = arith.maximumf %6, %7 : vector<8x32xf32>
    %9 = arith.truncf %8 : vector<8x32xf32> to vector<8x32xbf16>
    %c0_8 = arith.constant 0 : index
    %c0_9 = arith.constant 0 : index
    %10 = vector.load %arg9[%c0_8, %c0_9] : memref<32x48xbf16, #tpu.memory_space<vmem>>, vector<32x48xbf16>
    %cst_10 = arith.constant dense<0.000000e+00> : vector<8x48xf32>
    %11 = tpu.matmul %9, %10, %cst_10 {dimension_numbers = #tpu.dot_dimension_numbers<[1], [0], [0], [1], [0, 0, 1, 1], [], []>} : vector<8x32xbf16>, vector<32x48xbf16>, vector<8x48xf32> -> vector<8x48xf32>
    %c0_11 = arith.constant 0 : index
    %c0_12 = arith.constant 0 : index
    %12 = vector.load %arg6[%c0_11, %c0_12] : memref<8x128xbf16, #tpu.memory_space<vmem>>, vector<8x128xbf16>
    %c0_13 = arith.constant 0 : index
    %c0_14 = arith.constant 0 : index
    %13 = vector.load %arg2[%c0_13, %c0_14] : memref<128x16xbf16, #tpu.memory_space<vmem>>, vector<128x16xbf16>
    %cst_15 = arith.constant dense<0.000000e+00> : vector<8x16xf32>
    %14 = tpu.matmul %12, %13, %cst_15 {dimension_numbers = #tpu.dot_dimension_numbers<[1], [0], [0], [1], [0, 0, 1, 1], [], []>} : vector<8x128xbf16>, vector<128x16xbf16>, vector<8x16xf32> -> vector<8x16xf32>
    %c8 = arith.constant 8 : index
    %c0_16 = arith.constant 0 : index
    %15 = vector.load %arg13[%c8, %c0_16] : memref<64x1xf32, #tpu.memory_space<vmem>>, vector<8x1xf32>
    %16 = vector.broadcast %15 : vector<8x1xf32> to vector<8x16xf32>
    %17 = arith.addf %14, %16 : vector<8x16xf32>
    %cst_17 = arith.constant 0.000000e+00 : f32
    %18 = vector.broadcast %cst_17 : f32 to vector<8x16xf32>
    %19 = arith.maximumf %17, %18 : vector<8x16xf32>
    %20 = arith.truncf %19 : vector<8x16xf32> to vector<8x16xbf16>
    %c0_18 = arith.constant 0 : index
    %c0_19 = arith.constant 0 : index
    %21 = vector.load %arg10[%c0_18, %c0_19] : memref<16x48xbf16, #tpu.memory_space<vmem>>, vector<16x48xbf16>
    %cst_20 = arith.constant dense<0.000000e+00> : vector<8x48xf32>
    %22 = tpu.matmul %20, %21, %cst_20 {dimension_numbers = #tpu.dot_dimension_numbers<[1], [0], [0], [1], [0, 0, 1, 1], [], []>} : vector<8x16xbf16>, vector<16x48xbf16>, vector<8x48xf32> -> vector<8x48xf32>
    %c0_21 = arith.constant 0 : index
    %c0_22 = arith.constant 0 : index
    %23 = vector.load %arg7[%c0_21, %c0_22] : memref<16x128xbf16, #tpu.memory_space<vmem>>, vector<16x128xbf16>
    %c0_23 = arith.constant 0 : index
    %c0_24 = arith.constant 0 : index
    %24 = vector.load %arg3[%c0_23, %c0_24] : memref<128x8xbf16, #tpu.memory_space<vmem>>, vector<128x8xbf16>
    %cst_25 = arith.constant dense<0.000000e+00> : vector<16x8xf32>
    %25 = tpu.matmul %23, %24, %cst_25 {dimension_numbers = #tpu.dot_dimension_numbers<[1], [0], [0], [1], [0, 0, 1, 1], [], []>} : vector<16x128xbf16>, vector<128x8xbf16>, vector<16x8xf32> -> vector<16x8xf32>
    %c16 = arith.constant 16 : index
    %c0_26 = arith.constant 0 : index
    %26 = vector.load %arg13[%c16, %c0_26] : memref<64x1xf32, #tpu.memory_space<vmem>>, vector<16x1xf32>
    %27 = vector.broadcast %26 : vector<16x1xf32> to vector<16x8xf32>
    %28 = arith.addf %25, %27 : vector<16x8xf32>
    %cst_27 = arith.constant 0.000000e+00 : f32
    %29 = vector.broadcast %cst_27 : f32 to vector<16x8xf32>
    %30 = arith.maximumf %28, %29 : vector<16x8xf32>
    %31 = arith.truncf %30 : vector<16x8xf32> to vector<16x8xbf16>
    %c0_28 = arith.constant 0 : index
    %c0_29 = arith.constant 0 : index
    %32 = vector.load %arg11[%c0_28, %c0_29] : memref<8x48xbf16, #tpu.memory_space<vmem>>, vector<8x48xbf16>
    %cst_30 = arith.constant dense<0.000000e+00> : vector<16x48xf32>
    %33 = tpu.matmul %31, %32, %cst_30 {dimension_numbers = #tpu.dot_dimension_numbers<[1], [0], [0], [1], [0, 0, 1, 1], [], []>} : vector<16x8xbf16>, vector<8x48xbf16>, vector<16x48xf32> -> vector<16x48xf32>
    %c0_31 = arith.constant 0 : index
    %c0_32 = arith.constant 0 : index
    %34 = vector.load %arg8[%c0_31, %c0_32] : memref<32x256xbf16, #tpu.memory_space<vmem>>, vector<32x256xbf16>
    %c0_33 = arith.constant 0 : index
    %c0_34 = arith.constant 0 : index
    %35 = vector.load %arg4[%c0_33, %c0_34] : memref<256x4xbf16, #tpu.memory_space<vmem>>, vector<256x4xbf16>
    %cst_35 = arith.constant dense<0.000000e+00> : vector<32x4xf32>
    %36 = tpu.matmul %34, %35, %cst_35 {dimension_numbers = #tpu.dot_dimension_numbers<[1], [0], [0], [1], [0, 0, 1, 1], [], []>} : vector<32x256xbf16>, vector<256x4xbf16>, vector<32x4xf32> -> vector<32x4xf32>
    %c32 = arith.constant 32 : index
    %c0_36 = arith.constant 0 : index
    %37 = vector.load %arg13[%c32, %c0_36] : memref<64x1xf32, #tpu.memory_space<vmem>>, vector<32x1xf32>
    %38 = vector.broadcast %37 : vector<32x1xf32> to vector<32x4xf32>
    %39 = arith.addf %36, %38 : vector<32x4xf32>
    %cst_37 = arith.constant 0.000000e+00 : f32
    %40 = vector.broadcast %cst_37 : f32 to vector<32x4xf32>
    %41 = arith.maximumf %39, %40 : vector<32x4xf32>
    %42 = arith.truncf %41 : vector<32x4xf32> to vector<32x4xbf16>
    %c0_38 = arith.constant 0 : index
    %c0_39 = arith.constant 0 : index
    %43 = vector.load %arg12[%c0_38, %c0_39] : memref<4x48xbf16, #tpu.memory_space<vmem>>, vector<4x48xbf16>
    %cst_40 = arith.constant dense<0.000000e+00> : vector<32x48xf32>
    %44 = tpu.matmul %42, %43, %cst_40 {dimension_numbers = #tpu.dot_dimension_numbers<[1], [0], [0], [1], [0, 0, 1, 1], [], []>} : vector<32x4xbf16>, vector<4x48xbf16>, vector<32x48xf32> -> vector<32x48xf32>
    %45 = tpu.concatenate %11, %22, %33, %44 in 0 : vector<8x48xf32>, vector<8x48xf32>, vector<16x48xf32>, vector<32x48xf32> -> vector<64x48xf32>
    %46 = arith.truncf %45 : vector<64x48xf32> to vector<64x48xbf16>
    %c0_41 = arith.constant 0 : index
    %c0_42 = arith.constant 0 : index
    %c0_43 = arith.constant 0 : index
    %47 = vector.load %arg14[%c0_41, %c0_42, %c0_43] : memref<9x32x64xbf16, #tpu.memory_space<vmem>>, vector<1x32x64xbf16>
    %48 = vector.shape_cast %47 : vector<1x32x64xbf16> to vector<32x64xbf16>
    %49 = vector.extract_strided_slice %46 {offsets = [0, 0], sizes = [64, 40], strides = [1, 1]} : vector<64x48xbf16> to vector<64x40xbf16>
    %cst_44 = arith.constant dense<0.000000e+00> : vector<32x40xf32>
    %50 = tpu.matmul %48, %49, %cst_44 {dimension_numbers = #tpu.dot_dimension_numbers<[1], [0], [0], [1], [0, 0, 1, 1], [], []>} : vector<32x64xbf16>, vector<64x40xbf16>, vector<32x40xf32> -> vector<32x40xf32>
    %c1 = arith.constant 1 : index
    %c0_45 = arith.constant 0 : index
    %c0_46 = arith.constant 0 : index
    %51 = vector.load %arg14[%c1, %c0_45, %c0_46] : memref<9x32x64xbf16, #tpu.memory_space<vmem>>, vector<1x32x64xbf16>
    %52 = vector.shape_cast %51 : vector<1x32x64xbf16> to vector<32x64xbf16>
    %53 = vector.extract_strided_slice %46 {offsets = [0, 1], sizes = [64, 40], strides = [1, 1]} : vector<64x48xbf16> to vector<64x40xbf16>
    %cst_47 = arith.constant dense<0.000000e+00> : vector<32x40xf32>
    %54 = tpu.matmul %52, %53, %cst_47 {dimension_numbers = #tpu.dot_dimension_numbers<[1], [0], [0], [1], [0, 0, 1, 1], [], []>} : vector<32x64xbf16>, vector<64x40xbf16>, vector<32x40xf32> -> vector<32x40xf32>
    %55 = arith.addf %50, %54 : vector<32x40xf32>
    %c2 = arith.constant 2 : index
    %c0_48 = arith.constant 0 : index
    %c0_49 = arith.constant 0 : index
    %56 = vector.load %arg14[%c2, %c0_48, %c0_49] : memref<9x32x64xbf16, #tpu.memory_space<vmem>>, vector<1x32x64xbf16>
    %57 = vector.shape_cast %56 : vector<1x32x64xbf16> to vector<32x64xbf16>
    %58 = vector.extract_strided_slice %46 {offsets = [0, 2], sizes = [64, 40], strides = [1, 1]} : vector<64x48xbf16> to vector<64x40xbf16>
    %cst_50 = arith.constant dense<0.000000e+00> : vector<32x40xf32>
    %59 = tpu.matmul %57, %58, %cst_50 {dimension_numbers = #tpu.dot_dimension_numbers<[1], [0], [0], [1], [0, 0, 1, 1], [], []>} : vector<32x64xbf16>, vector<64x40xbf16>, vector<32x40xf32> -> vector<32x40xf32>
    %60 = arith.addf %55, %59 : vector<32x40xf32>
    %c3 = arith.constant 3 : index
    %c0_51 = arith.constant 0 : index
    %c0_52 = arith.constant 0 : index
    %61 = vector.load %arg14[%c3, %c0_51, %c0_52] : memref<9x32x64xbf16, #tpu.memory_space<vmem>>, vector<1x32x64xbf16>
    %62 = vector.shape_cast %61 : vector<1x32x64xbf16> to vector<32x64xbf16>
    %63 = vector.extract_strided_slice %46 {offsets = [0, 3], sizes = [64, 40], strides = [1, 1]} : vector<64x48xbf16> to vector<64x40xbf16>
    %cst_53 = arith.constant dense<0.000000e+00> : vector<32x40xf32>
    %64 = tpu.matmul %62, %63, %cst_53 {dimension_numbers = #tpu.dot_dimension_numbers<[1], [0], [0], [1], [0, 0, 1, 1], [], []>} : vector<32x64xbf16>, vector<64x40xbf16>, vector<32x40xf32> -> vector<32x40xf32>
    %65 = arith.addf %60, %64 : vector<32x40xf32>
    %c4 = arith.constant 4 : index
    %c0_54 = arith.constant 0 : index
    %c0_55 = arith.constant 0 : index
    %66 = vector.load %arg14[%c4, %c0_54, %c0_55] : memref<9x32x64xbf16, #tpu.memory_space<vmem>>, vector<1x32x64xbf16>
    %67 = vector.shape_cast %66 : vector<1x32x64xbf16> to vector<32x64xbf16>
    %68 = vector.extract_strided_slice %46 {offsets = [0, 4], sizes = [64, 40], strides = [1, 1]} : vector<64x48xbf16> to vector<64x40xbf16>
    %cst_56 = arith.constant dense<0.000000e+00> : vector<32x40xf32>
    %69 = tpu.matmul %67, %68, %cst_56 {dimension_numbers = #tpu.dot_dimension_numbers<[1], [0], [0], [1], [0, 0, 1, 1], [], []>} : vector<32x64xbf16>, vector<64x40xbf16>, vector<32x40xf32> -> vector<32x40xf32>
    %70 = arith.addf %65, %69 : vector<32x40xf32>
    %c5 = arith.constant 5 : index
    %c0_57 = arith.constant 0 : index
    %c0_58 = arith.constant 0 : index
    %71 = vector.load %arg14[%c5, %c0_57, %c0_58] : memref<9x32x64xbf16, #tpu.memory_space<vmem>>, vector<1x32x64xbf16>
    %72 = vector.shape_cast %71 : vector<1x32x64xbf16> to vector<32x64xbf16>
    %73 = vector.extract_strided_slice %46 {offsets = [0, 5], sizes = [64, 40], strides = [1, 1]} : vector<64x48xbf16> to vector<64x40xbf16>
    %cst_59 = arith.constant dense<0.000000e+00> : vector<32x40xf32>
    %74 = tpu.matmul %72, %73, %cst_59 {dimension_numbers = #tpu.dot_dimension_numbers<[1], [0], [0], [1], [0, 0, 1, 1], [], []>} : vector<32x64xbf16>, vector<64x40xbf16>, vector<32x40xf32> -> vector<32x40xf32>
    %75 = arith.addf %70, %74 : vector<32x40xf32>
    %c6 = arith.constant 6 : index
    %c0_60 = arith.constant 0 : index
    %c0_61 = arith.constant 0 : index
    %76 = vector.load %arg14[%c6, %c0_60, %c0_61] : memref<9x32x64xbf16, #tpu.memory_space<vmem>>, vector<1x32x64xbf16>
    %77 = vector.shape_cast %76 : vector<1x32x64xbf16> to vector<32x64xbf16>
    %78 = vector.extract_strided_slice %46 {offsets = [0, 6], sizes = [64, 40], strides = [1, 1]} : vector<64x48xbf16> to vector<64x40xbf16>
    %cst_62 = arith.constant dense<0.000000e+00> : vector<32x40xf32>
    %79 = tpu.matmul %77, %78, %cst_62 {dimension_numbers = #tpu.dot_dimension_numbers<[1], [0], [0], [1], [0, 0, 1, 1], [], []>} : vector<32x64xbf16>, vector<64x40xbf16>, vector<32x40xf32> -> vector<32x40xf32>
    %80 = arith.addf %75, %79 : vector<32x40xf32>
    %c7 = arith.constant 7 : index
    %c0_63 = arith.constant 0 : index
    %c0_64 = arith.constant 0 : index
    %81 = vector.load %arg14[%c7, %c0_63, %c0_64] : memref<9x32x64xbf16, #tpu.memory_space<vmem>>, vector<1x32x64xbf16>
    %82 = vector.shape_cast %81 : vector<1x32x64xbf16> to vector<32x64xbf16>
    %83 = vector.extract_strided_slice %46 {offsets = [0, 7], sizes = [64, 40], strides = [1, 1]} : vector<64x48xbf16> to vector<64x40xbf16>
    %cst_65 = arith.constant dense<0.000000e+00> : vector<32x40xf32>
    %84 = tpu.matmul %82, %83, %cst_65 {dimension_numbers = #tpu.dot_dimension_numbers<[1], [0], [0], [1], [0, 0, 1, 1], [], []>} : vector<32x64xbf16>, vector<64x40xbf16>, vector<32x40xf32> -> vector<32x40xf32>
    %85 = arith.addf %80, %84 : vector<32x40xf32>
    %c8_66 = arith.constant 8 : index
    %c0_67 = arith.constant 0 : index
    %c0_68 = arith.constant 0 : index
    %86 = vector.load %arg14[%c8_66, %c0_67, %c0_68] : memref<9x32x64xbf16, #tpu.memory_space<vmem>>, vector<1x32x64xbf16>
    %87 = vector.shape_cast %86 : vector<1x32x64xbf16> to vector<32x64xbf16>
    %88 = vector.extract_strided_slice %46 {offsets = [0, 8], sizes = [64, 40], strides = [1, 1]} : vector<64x48xbf16> to vector<64x40xbf16>
    %cst_69 = arith.constant dense<0.000000e+00> : vector<32x40xf32>
    %89 = tpu.matmul %87, %88, %cst_69 {dimension_numbers = #tpu.dot_dimension_numbers<[1], [0], [0], [1], [0, 0, 1, 1], [], []>} : vector<32x64xbf16>, vector<64x40xbf16>, vector<32x40xf32> -> vector<32x40xf32>
    %90 = arith.addf %85, %89 : vector<32x40xf32>
    %91 = vector.extract_strided_slice %90 {offsets = [0, 0], sizes = [32, 16], strides = [1, 1]} : vector<32x40xf32> to vector<32x16xf32>
    %92 = vector.broadcast %0 : vector<32x1xf32> to vector<32x16xf32>
    %93 = arith.addf %91, %92 : vector<32x16xf32>
    %cst_70 = arith.constant 0.000000e+00 : f32
    %94 = vector.broadcast %cst_70 : f32 to vector<32x16xf32>
    %95 = arith.maximumf %93, %94 : vector<32x16xf32>
    %c0_71 = arith.constant 0 : index
    %c0_72 = arith.constant 0 : index
    %c0_73 = arith.constant 0 : index
    %96 = vector.load %arg16[%c0_71, %c0_72, %c0_73] : memref<2x32x16xf32, #tpu.memory_space<vmem>>, vector<1x32x16xf32>
    %97 = vector.shape_cast %96 : vector<1x32x16xf32> to vector<32x16xf32>
    %98 = vector.shape_cast %95 : vector<32x16xf32> to vector<1x32x16xf32>
    tpu.vector_store %arg16[%c0_71, %c0_72, %c0_73], %98 {strides = array<i32>} : memref<2x32x16xf32, #tpu.memory_space<vmem>>, vector<1x32x16xf32>,
    %99 = vector.extract_strided_slice %90 {offsets = [0, 24], sizes = [32, 16], strides = [1, 1]} : vector<32x40xf32> to vector<32x16xf32>
    %100 = vector.broadcast %0 : vector<32x1xf32> to vector<32x16xf32>
    %101 = arith.addf %99, %100 : vector<32x16xf32>
    %cst_74 = arith.constant 0.000000e+00 : f32
    %102 = vector.broadcast %cst_74 : f32 to vector<32x16xf32>
    %103 = arith.maximumf %101, %102 : vector<32x16xf32>
    %c1_75 = arith.constant 1 : index
    %c0_76 = arith.constant 0 : index
    %c0_77 = arith.constant 0 : index
    %104 = vector.load %arg16[%c1_75, %c0_76, %c0_77] : memref<2x32x16xf32, #tpu.memory_space<vmem>>, vector<1x32x16xf32>
    %105 = vector.shape_cast %104 : vector<1x32x16xf32> to vector<32x16xf32>
    %106 = vector.shape_cast %103 : vector<32x16xf32> to vector<1x32x16xf32>
    tpu.vector_store %arg16[%c1_75, %c0_76, %c0_77], %106 {strides = array<i32>} : memref<2x32x16xf32, #tpu.memory_space<vmem>>, vector<1x32x16xf32>,
    return
  }
  func.func @transform_0(%arg0: i32) -> (i32, i32) {
    %c0_i32 = arith.constant 0 : i32
    %c0_i32_0 = arith.constant 0 : i32
    %c0_i32_1 = arith.constant 0 : i32
    return %c0_i32, %c0_i32_0 : i32, i32
  }
  func.func @transform_1(%arg0: i32) -> (i32, i32) {
    %c0_i32 = arith.constant 0 : i32
    %c0_i32_0 = arith.constant 0 : i32
    %c0_i32_1 = arith.constant 0 : i32
    return %c0_i32, %c0_i32_0 : i32, i32
  }
  func.func @transform_2(%arg0: i32) -> (i32, i32) {
    %c0_i32 = arith.constant 0 : i32
    %c0_i32_0 = arith.constant 0 : i32
    %c0_i32_1 = arith.constant 0 : i32
    return %c0_i32, %c0_i32_0 : i32, i32
  }
  func.func @transform_3(%arg0: i32) -> (i32, i32) {
    %c0_i32 = arith.constant 0 : i32
    %c0_i32_0 = arith.constant 0 : i32
    %c0_i32_1 = arith.constant 0 : i32
    return %c0_i32, %c0_i32_0 : i32, i32
  }
  func.func @transform_4(%arg0: i32) -> (i32, i32) {
    %c0_i32 = arith.constant 0 : i32
    %c0_i32_0 = arith.constant 0 : i32
    %c0_i32_1 = arith.constant 0 : i32
    return %c0_i32, %c0_i32_0 : i32, i32
  }
  func.func @transform_5(%arg0: i32) -> (i32, i32) {
    %c0_i32 = arith.constant 0 : i32
    %c0_i32_0 = arith.constant 0 : i32
    %c0_i32_1 = arith.constant 0 : i32
    return %c0_i32, %c0_i32_0 : i32, i32
  }
  func.func @transform_6(%arg0: i32) -> (i32, i32) {
    %c0_i32 = arith.constant 0 : i32
    %c0_i32_0 = arith.constant 0 : i32
    %c0_i32_1 = arith.constant 0 : i32
    return %c0_i32, %c0_i32_0 : i32, i32
  }
  func.func @transform_7(%arg0: i32) -> (i32, i32) {
    %c0_i32 = arith.constant 0 : i32
    %c0_i32_0 = arith.constant 0 : i32
    %c0_i32_1 = arith.constant 0 : i32
    return %c0_i32, %c0_i32_0 : i32, i32
  }
  func.func @transform_8(%arg0: i32) -> (i32, i32) {
    %c0_i32 = arith.constant 0 : i32
    %c0_i32_0 = arith.constant 0 : i32
    %c0_i32_1 = arith.constant 0 : i32
    return %c0_i32, %c0_i32_0 : i32, i32
  }
  func.func @transform_9(%arg0: i32) -> (i32, i32) {
    %c0_i32 = arith.constant 0 : i32
    %c0_i32_0 = arith.constant 0 : i32
    %c0_i32_1 = arith.constant 0 : i32
    return %c0_i32, %c0_i32_0 : i32, i32
  }
  func.func @transform_10(%arg0: i32) -> (i32, i32) {
    %c0_i32 = arith.constant 0 : i32
    %c0_i32_0 = arith.constant 0 : i32
    %c0_i32_1 = arith.constant 0 : i32
    return %c0_i32, %c0_i32_0 : i32, i32
  }
  func.func @transform_11(%arg0: i32) -> (i32, i32) {
    %c0_i32 = arith.constant 0 : i32
    %c0_i32_0 = arith.constant 0 : i32
    %c0_i32_1 = arith.constant 0 : i32
    return %c0_i32, %c0_i32_0 : i32, i32
  }
  func.func @transform_12(%arg0: i32) -> (i32, i32) {
    %c0_i32 = arith.constant 0 : i32
    %c0_i32_0 = arith.constant 0 : i32
    %c0_i32_1 = arith.constant 0 : i32
    return %c0_i32, %c0_i32_0 : i32, i32
  }
  func.func @transform_13(%arg0: i32) -> (i32, i32, i32) {
    %c0_i32 = arith.constant 0 : i32
    %c0_i32_0 = arith.constant 0 : i32
    %c0_i32_1 = arith.constant 0 : i32
    %c0_i32_2 = arith.constant 0 : i32
    return %c0_i32, %c0_i32_0, %c0_i32_1 : i32, i32, i32
  }
  func.func @transform_14(%arg0: i32) -> (i32, i32) {
    %c0_i32 = arith.constant 0 : i32
    %c0_i32_0 = arith.constant 0 : i32
    %c0_i32_1 = arith.constant 0 : i32
    return %c0_i32, %c0_i32_0 : i32, i32
  }
  func.func @transform_15(%arg0: i32) -> (i32, i32, i32) {
    %c0_i32 = arith.constant 0 : i32
    %c0_i32_0 = arith.constant 0 : i32
    %c0_i32_1 = arith.constant 0 : i32
    %c0_i32_2 = arith.constant 0 : i32
    return %c0_i32, %c0_i32_0, %c0_i32_1 : i32, i32, i32
  }
}

</mosaic_0001>

<bundles_post_ra>
// kernel: tpu_custom_call.1
= control target key start
LH: loop header
LB: loop body
LE: loop exit
PB: predicated region body
PF: predicated region fallthrough
CT: control target
= control target key end

     0   :  { %v1635_v2 = vmov 0   ;;  %vm157_vm0 = vcmask 261120   ;;  %vm268_vm1 = vcmask 130048   ;;  %vm391_vm2 = vcmask 1043456   ;;  %s1638_s24 = smov 124   ;;  %s1640_s25 = smov 123   ;;  %s2074_s0 = inlined_call_operand.vmem [shape: bf16[128,32], index: 0, kind: input, shape index: {}]   ;;  %s2075_s1 = inlined_call_operand.vmem [shape: bf16[128,16], index: 1, kind: input, shape index: {}]   ;;  %s2076_s12 = inlined_call_operand.vmem [shape: f32[64,1], index: 12, kind: input, shape index: {}]   ;;  %s2077_s4 = inlined_call_operand.vmem [shape: bf16[8,128], index: 4, kind: input, shape index: {}]   ;;  %s2078_s5 = inlined_call_operand.vmem [shape: bf16[8,128], index: 5, kind: input, shape index: {}]   ;;  %s2079_s9 = inlined_call_operand.vmem [shape: bf16[16,48], index: 9, kind: input, shape index: {}]   ;;  %s2080_s2 = inlined_call_operand.vmem [shape: bf16[128,8], index: 2, kind: input, shape index: {}]   ;;  %s2081_s8 = inlined_call_operand.vmem [shape: bf16[32,48], index: 8, kind: input, shape index: {}]   ;;  %s2082_s6 = inlined_call_operand.vmem [shape: bf16[16,128], index: 6, kind: input, shape index: {}]   ;;  %s2083_s3 = inlined_call_operand.vmem [shape: bf16[256,4], index: 3, kind: input, shape index: {}]   ;;  %s2084_s10 = inlined_call_operand.vmem [shape: bf16[8,48], index: 10, kind: input, shape index: {}]   ;;  %s2085_s7 = inlined_call_operand.vmem [shape: bf16[32,256], index: 7, kind: input, shape index: {}]   ;;  %s2086_s11 = inlined_call_operand.vmem [shape: bf16[4,48], index: 11, kind: input, shape index: {}]   ;;  %s2087_s14 = inlined_call_operand.vmem [shape: f32[32,1], index: 14, kind: input, shape index: {}]   ;;  %s2088_s13 = inlined_call_operand.vmem [shape: bf16[9,32,64], index: 13, kind: input, shape index: {}]   ;;  %s2089_s15 = inlined_call_operand.vmem [shape: f32[2,32,16], index: 15, kind: output, shape index: {}]  }
   0x1   :  { %v1563_v0 = vld [vmem:[%s2074_s0 + $0x38] sm:$0xff]  ;;  %1632 = vset.pattern.permute.xlu0 %v1635_v2  ;;  %1633 = vset.pattern.permute.xlu1 %v1635_v2  ;;  %v1562_v3 = vld [vmem:[%s2074_s0 + $0x30] sm:$0xff]  ;;  %v1561_v5 = vld [vmem:[%s2074_s0 + $0x28] sm:$0xff]  ;;  %vm387_vm3 = vcmask 64512   ;;  %vm637_vm4 = vcmask 1041408   ;;  %vm630_vm5 = vcmask 31744  }
   0x2   :  { %v1573_v1 = vld [vmem:[%s2075_s1 + $0x38] sm:$0xff]  ;;  %1634 = vset.pattern.permute.xlu2 %v1635_v2  ;;  %126 = vmatpush.bf16.msra.mxu0 %v1563_v0  ;;  %v1572_v4 = vld [vmem:[%s2075_s1 + $0x30] sm:$0xff]  ;;  %v1571_v6 = vld [vmem:[%s2075_s1 + $0x28] sm:$0xff]  ;;  %s1641_s26 = smov 122   ;;  %s1643_s27 = smov 120   ;;  %vm719_vm6 = vcmask 523264  }
   0x3   :  { %245 = vmatpush.bf16.msra.mxu2 %v1573_v1  ;;  %v191_v7 = vld [vmem:[%s2076_s12 + $0x8] sm:$0xff]  ;;  %v1560_v8 = vld [vmem:[%s2074_s0 + $0x20] sm:$0xff]  ;;  %v1559_v11 = vld [vmem:[%s2074_s0 + $0x18] sm:$0xff] }
   0x4   :  { %194 = vperm.xlu0 %1632, %v191_v7   ;;  %v1570_v9 = vld [vmem:[%s2075_s1 + $0x20] sm:$0xff]  ;;  %v1569_v12 = vld [vmem:[%s2075_s1 + $0x18] sm:$0xff]  ;;  %v1558_v13 = vld [vmem:[%s2074_s0 + $0x10] sm:$0xff] }
   0x5   :  { %v72_v10 = vld [vmem:[%s2076_s12] sm:$0xff]  ;;  %v1568_v14 = vld [vmem:[%s2075_s1 + $0x10] sm:$0xff]  ;;  %v1557_v16 = vld [vmem:[%s2074_s0 + $0x8] sm:$0xff] }
   0x6   :  { %127 = vmatpush.bf16.msra.mxu0 %v1562_v3  ;;  %v447_v15 = vld [vmem:[%s2076_s12 + $0x30] sm:$0xff]  ;;  %v1567_v17 = vld [vmem:[%s2075_s1 + $0x8] sm:$0xff]  ;;  %v1556_v18 = vld [vmem:[%s2074_s0] sm:$0xff] }
   0x7   :  { %246 = vmatpush.bf16.msra.mxu2 %v1572_v4  ;;  %v1566_v19 = vld [vmem:[%s2075_s1] sm:$0xff]  ;;  %v1583_v23 = vld [vmem:[%s2080_s2 + $0x38] sm:$0xff]  ;;  %v1565_v24 = vld [vmem:[%s2081_s8 + $0x8] sm:$0xff] }
   0x8   :  { %v55_v20 = vld [vmem:[%s2077_s4] sm:$0xf]  ;;  %167 = vmatpush.bf16.msra.mxu1 %v1565_v24  ;;  %v1582_v25 = vld [vmem:[%s2080_s2 + $0x30] sm:$0xff]  ;;  %v1581_v27 = vld [vmem:[%s2080_s2 + $0x28] sm:$0xff] }
   0x9   :  { %v174_v21 = vld [vmem:[%s2078_s5] sm:$0xf]  ;;  %v1579_v29 = vld [vmem:[%s2080_s2 + $0x18] sm:$0xff]  ;;  %v1578_v30 = vld [vmem:[%s2080_s2 + $0x10] sm:$0xff] }
   0xa   :  { %128 = vmatpush.bf16.msra.mxu0 %v1561_v5  ;;  %v1574_v22 = vld [vmem:[%s2079_s9] sm:$0xff]  ;;  %v1577_v31 = vld [vmem:[%s2080_s2 + $0x8] sm:$0xff]  ;;  %v303_v34 = vld [vmem:[%s2076_s12 + $0x10] sm:$0xff]  ;;  %s1644_s9 = smov 104  }
   0xb   :  { %247 = vmatpush.bf16.msra.mxu2 %v1571_v6  ;;  %279 = vmatpush.bf16.msra.mxu3 %v1574_v22  ;;  %v1564_v26 = vld [vmem:[%s2081_s8] sm:$0xff]  ;;  %v304_v39 = vld [vmem:[%s2076_s12 + $0x18] sm:$0xff]  ;;  %v1602_v52 = vld [vmem:[%s2083_s3 + $0x70] sm:$0xff] }
   0xc   :  { %75 = vperm.xlu0 %1632, %v72_v10   ;;  %168 = vmatpush.bf16.msra.mxu1 %v1564_v26  ;;  %v1580_v28 = vld [vmem:[%s2080_s2 + $0x20] sm:$0xff]  ;;  %v448_v46 = vld [vmem:[%s2076_s12 + $0x38] sm:$0xff]  ;;  %v1601_v54 = vld [vmem:[%s2083_s3 + $0x68] sm:$0xff] }
   0xd   :  { %v1576_v33 = vld [vmem:[%s2080_s2] sm:$0xff]  ;;  %307 = vperm.xlu1 %1633, %v303_v34   ;;  %v1603_v49 = vld [vmem:[%s2083_s3 + $0x78] sm:$0xff]  ;;  %v1594_v55 = vld [vmem:[%s2083_s3 + $0x30] sm:$0xff] }
   0xe   :  { %129 = vmatpush.bf16.msra.mxu0 %v1560_v8  ;;  %v1575_v48 = vld [vmem:[%s2082_s6] sm:$0xff]  ;;  %v1595_v53 = vld [vmem:[%s2083_s3 + $0x38] sm:$0xff]  ;;  %v1593_v58 = vld [vmem:[%s2083_s3 + $0x28] sm:$0xff]  ;;  %s1639_s6 = smov 125  }
   0xf   :  { %248 = vmatpush.bf16.msra.mxu2 %v1570_v9  ;;  %369 = vmatpush.bf16.msrb.mxu3 %v1583_v23  ;;  %v386_v50 = vld [vmem:[%s2084_s10] sm:$0xf]  ;;  %v1599_v59 = vld [vmem:[%s2083_s3 + $0x58] sm:$0xff]  ;;  %v1598_v62 = vld [vmem:[%s2083_s3 + $0x50] sm:$0xff]  ;;  %s1642_s10 = smov 121  }
  0x10   :  { %v393_v51 = vsel %vm391_vm2, %v386_v50, 0  ;;  %v1600_v56 = vld [vmem:[%s2083_s3 + $0x60] sm:$0xff]  ;;  %v1591_v63 = vld [vmem:[%s2083_s3 + $0x18] sm:$0xff]  ;;  %v1597_v1 = vld [vmem:[%s2083_s3 + $0x48] sm:$0xff] }
  0x11   :  { %402 = vmatpush.bf16.msrb.mxu1 %v393_v51  ;;  %v1592_v60 = vld [vmem:[%s2083_s3 + $0x20] sm:$0xff]  ;;  %v1590_v3 = vld [vmem:[%s2083_s3 + $0x10] sm:$0xff]  ;;  %v1352_v7 = vld [vmem:[%s2085_s7 + $0x8] sm:$0xf0] }
  0x12   :  { %130 = vmatpush.bf16.msra.mxu0 %v1559_v11  ;;  %v1596_v5 = vld [vmem:[%s2083_s3 + $0x40] sm:$0xff]  ;;  %v1589_v10 = vld [vmem:[%s2083_s3 + $0x8] sm:$0xff]  ;;  %v1360_v22 = vld [vmem:[%s2085_s7 + $0x18] sm:$0xf0] }
  0x13   :  { %249 = vmatpush.bf16.msra.mxu2 %v1569_v12  ;;  %370 = vmatpush.bf16.msrb.mxu3 %v1582_v25  ;;  %v1584_v6 = vld [vmem:[%s2085_s7 + $0x4] sm:$0xf] }
  0x14   :  { %461 = vperm.xlu0 %1632, %v447_v15   ;;  %v1355_v12 = vor.u32 %v1584_v6, %v1352_v7 }
  0x15   :  { %312 = vperm.xlu1 %1633, %v304_v39  }
  0x16   :  { %131 = vmatpush.bf16.msra.mxu0 %v1558_v13 }
  0x17   :  { %250 = vmatpush.bf16.msra.mxu2 %v1568_v14  ;;  %371 = vmatpush.bf16.msrb.mxu3 %v1581_v27  ;;  %v1588_v14 = vld [vmem:[%s2083_s3] sm:$0xff] }
  0x18   :  { %v445_v27 = vld [vmem:[%s2076_s12 + $0x20] sm:$0xff] }
  0x19   :  { %451 = vperm.xlu2 %1634, %v445_v27  }
  0x1a   :  { %132 = vmatpush.bf16.msra.mxu0 %v1557_v16 }
  0x1b   :  { %251 = vmatpush.bf16.msra.mxu2 %v1567_v17  ;;  %372 = vmatpush.bf16.msrb.mxu3 %v1580_v28  ;;  %v446_v28 = vld [vmem:[%s2076_s12 + $0x28] sm:$0xff] }
  0x1d   :  { %466 = vperm.xlu1 %1633, %v448_v46  }
  0x1e   :  { %133 = vmatpush.bf16.msra.mxu0 %v1556_v18 }
  0x1f   :  { %252 = vmatpush.bf16.msra.mxu2 %v1566_v19  ;;  %373 = vmatpush.bf16.msrb.mxu3 %v1579_v29  ;;  %v1350_v29 = vld [vmem:[%s2085_s7] sm:$0xf] }
  0x21   :  { %134 = vmatmul.bf16.vlgmr.msra.gmra.mxu0 %v55_v20  ;;  %456 = vperm.xlu2 %1634, %v446_v28   ;;  %v1605_v28 = vld [vmem:[%s2088_s13 + $0x8] sm:$0xff] }
  0x22   :  { %253 = vmatmul.bf16.vlgmr.msra.gmra.mxu2 %v174_v21  ;;  %604 = vmatpush.bf16.msrb.mxu0 %v1603_v49  ;;  %v1586_v21 = vld [vmem:[%s2085_s7 + $0x14] sm:$0xf] }
  0x23   :  { %374 = vmatpush.bf16.msrb.mxu3 %v1578_v30  ;;  %v1363_v25 = vor.u32 %v1586_v21, %v1360_v22  ;;  %v1585_v30 = vld [vmem:[%s2085_s7 + $0x4] sm:$0xf0]  ;;  %v51_v21 = vld [vmem:[%s2087_s14] sm:$0xff]  ;;  %v54_v22 = vld [vmem:[%s2087_s14 + $0x18] sm:$0xff] }
  0x26   :  { %605 = vmatpush.bf16.msrb.mxu0 %v1602_v52 }
  0x27   :  { %375 = vmatpush.bf16.msrb.mxu3 %v1577_v31  ;;  %v1351_v31 = vor.u32 %v1585_v30, %v1350_v29 }
  0x2a   :  { %606 = vmatpush.bf16.msrb.mxu0 %v1601_v54 }
  0x2b   :  { %376 = vmatpush.bf16.msrb.mxu3 %v1576_v33  ;;  %v1587_v33 = vld [vmem:[%s2085_s7 + $0x14] sm:$0xf0] }
  0x2e   :  { %607 = vmatpush.bf16.msrb.mxu0 %v1600_v56 }
  0x32   :  { %608 = vmatpush.bf16.msrb.mxu0 %v1599_v59 }
  0x36   :  { %609 = vmatpush.bf16.msrb.mxu0 %v1598_v62 }
  0x3a   :  { %610 = vmatpush.bf16.msrb.mxu0 %v1597_v1 }
  0x3e   :  { %611 = vmatpush.bf16.msrb.mxu0 %v1596_v5 }
  0x41   :  { %612 = vmatmul.bf16.vlgmr.msrb.gmra.mxu0 %v1355_v12 }
  0x51   :  { %617 = vmatmul.bf16.gmra.mxu0 %v1363_v25  ;;  %v52_v25 = vld [vmem:[%s2087_s14 + $0x8] sm:$0xff] }
  0x76   :  { %v195_v32 = vpop.permute.xlu0 %194 }
  0x7e   :  { %v76_v35 = vpop.permute.xlu0 %75 }
  0x7f   :  { %v308_v15 = vpop.permute.xlu1 %307 }
  0x86   :  { %v462_v59 = vpop.permute.xlu0 %461 }
  0x87   :  { %v313_v18 = vpop.permute.xlu1 %312 }
  0x9e   :  { %v135_v36 = vpop.f32.mrf.mxu0 }
  0x9f   :  { %v136_v37 = vadd.f32 %v135_v36, %v76_v35  ;;  %v629_v35 = vld [vmem:[%s2086_s11] sm:$0x3]  ;;  %s1637_s11 = smov 126  }
  0xa0   :  { %v639_v36 = vsel %vm637_vm4, %v629_v35, 0 }
  0xa1   :  { %v139_v38 = vmax.f32 %v136_v37, 0.0  ;;  %648 = vmatpush.bf16.msrb.mxu2 %v639_v36 }
  0xa3   :  { %v140_v40 = vpack.c.bf16 %v139_v38, %v139_v38 }
  0xa5   :  { %v254_v41 = vpop.f32.mrf.mxu2  ;;  %1273 = vmatmul.msk.bf16.vlgmr.msra.gmra.mxu1 %vm157_vm0, %v140_v40 }
  0xa6   :  { %v255_v42 = vadd.f32 %v254_v41, %v195_v32  ;;  %v137_v43 = vpop.f32.mrf.mxu0  ;;  %585 = vmatpush.bf16.msra.mxu1 %v1595_v53  ;;  %v1358_v32 = vld [vmem:[%s2085_s7 + $0x10] sm:$0xf]  ;;  %s1636_s7 = smov 127  }
  0xa7   :  { %v1359_v34 = vor.u32 %v1587_v33, %v1358_v32  ;;  %v452_v43 = vpop.permute.xlu2 %451  ;;  %v1606_v33 = vld [vmem:[%s2088_s13 + $0x10] sm:$0xff] }
  0xa8   :  { %v258_v44 = vmax.f32 %v255_v42, 0.0 }
  0xaa   :  { %v259_v45 = vpack.c.bf16 %v258_v44, %v258_v44  ;;  %586 = vmatpush.bf16.msra.mxu1 %v1594_v55 }
  0xac   :  { %1310 = vmatmul.msk.bf16.vlgmr.msra.gmra.mxu3 %vm268_vm1, %v259_v45 }
  0xad   :  { %v256_v47 = vpop.f32.mrf.mxu2 }
  0xae   :  { %587 = vmatpush.bf16.msra.mxu1 %v1593_v58 }
  0xb2   :  { %588 = vmatpush.bf16.msra.mxu1 %v1592_v60 }
  0xb6   :  { %589 = vmatpush.bf16.msra.mxu1 %v1591_v63 }
  0xba   :  { %590 = vmatpush.bf16.msra.mxu1 %v1590_v3 }
  0xbc   :  { %377 = vmatmul.bf16.vlgmr.msrb.gmra.mxu3 %v1575_v48  ;;  %v457_v48 = vpop.permute.xlu2 %456 }
  0xbe   :  { %591 = vmatpush.bf16.msra.mxu1 %v1589_v10  ;;  %v613_v45 = vpop.f32.mrf.mxu0 }
  0xc2   :  { %592 = vmatpush.bf16.msra.mxu1 %v1588_v14 }
  0xc6   :  { %v615_v49 = vpop.f32.mrf.mxu0 }
  0xce   :  { %v618_v58 = vpop.f32.mrf.mxu0 }
  0xd6   :  { %v620_v1 = vpop.f32.mrf.mxu0 }
 0x122   :  { %v170_v57 = vpop.f32.mrf.mxu1 }
 0x123   :  { %v660_v0 = vpack.c.bf16 %v170_v57, %v170_v57 }
 0x125   :  { %v695_v8 = vunpack.c.l.b16 %v660_v0 }
 0x12a   :  { %v172_v61 = vpop.f32.mrf.mxu1 }
 0x12b   :  { %v467_v61 = vpop.permute.xlu1 %466 }
 0x12f   :  { %v281_v2 = vpop.f32.mrf.mxu3 }
 0x130   :  { %v661_v4 = vpack.c.bf16 %v281_v2, %v281_v2 }
 0x132   :  { %v696_v9 = vunpack.c.l.b16 %v661_v4 }
 0x134   :  { %v1888_v11 = vpack.c.b16 %v696_v9, %v695_v8 }
 0x137   :  { %v283_v13 = vpop.f32.mrf.mxu3 }
 0x13f   :  { %v378_v16 = vpop.f32.mrf.mxu3 }
 0x140   :  { %v379_v17 = vadd.f32 %v378_v16, %v308_v15 }
 0x142   :  { %v383_v23 = vmax.f32 %v379_v17, 0.0 }
 0x147   :  { %v380_v19 = vpop.f32.mrf.mxu3 }
 0x148   :  { %v381_v20 = vadd.f32 %v380_v19, %v313_v18 }
 0x14a   :  { %v384_v24 = vmax.f32 %v381_v20, 0.0 }
 0x14c   :  { %v385_v26 = vpack.c.bf16 %v384_v24, %v383_v23  ;;  %v53_v23 = vld [vmem:[%s2087_s14 + $0x10] sm:$0xff]  ;;  %v1604_v24 = vld [vmem:[%s2088_s13] sm:$0xff] }
 0x14e   :  { %1347 = vmatmul.msk.bf16.vlgmr.msrb.gmra.mxu1 %vm387_vm3, %v385_v26 }
 0x15e   :  { %593 = vmatmul.bf16.vlgmr.msra.gmra.mxu1 %v1351_v31 }
 0x16e   :  { %598 = vmatmul.bf16.gmra.mxu1 %v1359_v34 }
 0x1cb   :  { %v404_v37 = vpop.f32.mrf.mxu1 }
 0x1cc   :  { %v662_v38 = vpack.c.bf16 %v404_v37, %v404_v37 }
 0x1ce   :  { %v697_v41 = vunpack.c.l.b16 %v662_v38 }
 0x1d3   :  { %v406_v39 = vpop.f32.mrf.mxu1 }
 0x1d4   :  { %v663_v40 = vpack.c.bf16 %v406_v39, %v406_v39 }
 0x1d6   :  { %v698_v42 = vunpack.c.l.b16 %v663_v40  ;;  %v1607_v40 = vld [vmem:[%s2088_s13 + $0x18] sm:$0xff] }
 0x1d8   :  { %v1920_v44 = vpack.c.b16 %v698_v42, %v697_v41 }
 0x1da   :  { %709 = vrot.lane.b32.xlu1 %v1920_v44, %s1636_s7 }
 0x1db   :  { %v594_v46 = vpop.f32.mrf.mxu1 }
 0x1dc   :  { %v595_v47 = vadd.f32 %v594_v46, %v452_v43 }
 0x1de   :  { %v614_v51 = vadd.f32 %v613_v45, %v595_v47  ;;  %v1612_v45 = vld [vmem:[%s2088_s13 + $0x40] sm:$0xff] }
 0x1e0   :  { %v623_v54 = vmax.f32 %v614_v51, 0.0 }
 0x1e3   :  { %v596_v50 = vpop.f32.mrf.mxu1 }
 0x1e4   :  { %v597_v52 = vadd.f32 %v596_v50, %v457_v48  ;;  %v1608_v48 = vld [vmem:[%s2088_s13 + $0x20] sm:$0xff]  ;;  %v1610_v50 = vld [vmem:[%s2088_s13 + $0x30] sm:$0xff] }
 0x1e6   :  { %v616_v53 = vadd.f32 %v615_v49, %v597_v52 }
 0x1e8   :  { %v624_v55 = vmax.f32 %v616_v53, 0.0 }
 0x1ea   :  { %v627_v56 = vpack.c.bf16 %v624_v55, %v623_v54  ;;  %v1613_v54 = vld [vmem:[%s2088_s13 + $0x48] sm:$0xff] }
 0x1eb   :  { %v599_v57 = vpop.f32.mrf.mxu1 }
 0x1ec   :  { %1428 = vmatmul.msk.bf16.vlgmr.msrb.gmra.mxu2 %vm630_vm5, %v627_v56  ;;  %v600_v60 = vadd.f32 %v599_v57, %v462_v59  ;;  %v1609_v56 = vld [vmem:[%s2088_s13 + $0x28] sm:$0xff]  ;;  %v1614_v59 = vld [vmem:[%s2088_s13 + $0x50] sm:$0xff] }
 0x1ee   :  { %v619_v63 = vadd.f32 %v618_v58, %v600_v60  ;;  %v1611_v60 = vld [vmem:[%s2088_s13 + $0x38] sm:$0xff] }
 0x1f0   :  { %v625_v3 = vmax.f32 %v619_v63, 0.0 }
 0x1f3   :  { %v601_v62 = vpop.f32.mrf.mxu1 }
 0x1f4   :  { %v602_v0 = vadd.f32 %v601_v62, %v467_v61 }
 0x1f6   :  { %v621_v2 = vadd.f32 %v620_v1, %v602_v0  ;;  %v1616_v1 = vld [vmem:[%s2088_s13 + $0x60] sm:$0xff] }
 0x1f8   :  { %v626_v4 = vmax.f32 %v621_v2, 0.0 }
 0x1fa   :  { %v628_v5 = vpack.c.bf16 %v626_v4, %v625_v3  ;;  %v1615_v3 = vld [vmem:[%s2088_s13 + $0x58] sm:$0xff]  ;;  %v1618_v4 = vld [vmem:[%s2088_s13 + $0x70] sm:$0xff] }
 0x1fc   :  { %1429 = vmatmul.msk.bf16.gmra.mxu2 %vm630_vm5, %v628_v5 }
 0x24c   :  { %v710_v26 = vpop.permute.xlu1 %709 }
 0x26f   :  { %v650_v6 = vpop.f32.mrf.mxu2 }
 0x270   :  { %v664_v7 = vpack.c.bf16 %v650_v6, %v650_v6  ;;  %v1620_v6 = vld [vmem:[%s2088_s13 + $0x80] sm:$0xff] }
 0x272   :  { %v699_v10 = vunpack.c.l.b16 %v664_v7  ;;  %v1617_v7 = vld [vmem:[%s2088_s13 + $0x68] sm:$0xff] }
 0x277   :  { %v652_v8 = vpop.f32.mrf.mxu2 }
 0x278   :  { %v665_v9 = vpack.c.bf16 %v652_v8, %v652_v8  ;;  %v1619_v8 = vld [vmem:[%s2088_s13 + $0x78] sm:$0xff] }
 0x27a   :  { %v700_v12 = vunpack.c.l.b16 %v665_v9  ;;  %v1621_v9 = vld [vmem:[%s2088_s13 + $0x88] sm:$0xff] }
 0x27c   :  { %v705_v13 = vpack.c.b16 %v700_v12, %v699_v10 }
 0x27e   :  { %803 = vrot.lane.b32.xlu1 %v705_v13, %s1637_s11  ;;  %711 = vrot.lane.b32.xlu0 %v705_v13, %s1636_s7 }
 0x27f   :  { %v655_v14 = vpop.f32.mrf.mxu2 }
 0x280   :  { %v666_v15 = vpack.c.bf16 %v655_v14, %v655_v14 }
 0x282   :  { %v701_v18 = vunpack.c.l.b16 %v666_v15 }
 0x286   :  { %915 = vrot.lane.b32.xlu1 %v705_v13, %s1638_s24  ;;  %859 = vrot.lane.b32.xlu0 %v705_v13, %s1639_s6 }
 0x287   :  { %v657_v16 = vpop.f32.mrf.mxu2 }
 0x288   :  { %v667_v17 = vpack.c.bf16 %v657_v16, %v657_v16 }
 0x28a   :  { %v702_v19 = vunpack.c.l.b16 %v667_v17 }
 0x28c   :  { %v706_v20 = vpack.c.b16 %v702_v19, %v701_v18 }
 0x28e   :  { %855 = vrot.lane.b32.xlu1 %v1888_v11, %s1639_s6  ;;  %913 = vrot.lane.b32.xlu0 %v1920_v44, %s1638_s24 }
 0x28f   :  { %713 = vrot.lane.b32.xlu2 %v706_v20, %s1636_s7  ;;  %769 = vmatpush.bf16.msra.mxu2 %v706_v20 }
 0x293   :  { %770 = vmatpush.bf16.msra.mxu2 %v705_v13 }
 0x296   :  { %917 = vrot.lane.b32.xlu1 %v706_v20, %s1638_s24  ;;  %805 = vrot.lane.b32.xlu0 %v706_v20, %s1637_s11 }
 0x297   :  { %707 = vrot.lane.b32.xlu2 %v1888_v11, %s1636_s7  ;;  %771 = vmatpush.bf16.msra.mxu2 %v1920_v44 }
 0x29b   :  { %772 = vmatpush.bf16.msra.mxu2 %v1888_v11 }
 0x29e   :  { %969 = vrot.lane.b32.xlu1 %v1920_v44, %s1640_s25  ;;  %861 = vrot.lane.b32.xlu0 %v706_v20, %s1639_s6 }
 0x29f   :  { %801 = vrot.lane.b32.xlu2 %v1920_v44, %s1637_s11  ;;  %1452 = vmatmul.msk.bf16.vlgmr.msra.gmra.mxu2 %vm719_vm6, %v1604_v24 }
 0x2a6   :  { %1029 = vrot.lane.b32.xlu1 %v706_v20, %s1641_s26  ;;  %1027 = vrot.lane.b32.xlu0 %v705_v13, %s1641_s26 }
 0x2a7   :  { %799 = vrot.lane.b32.xlu2 %v1888_v11, %s1637_s11 }
 0x2ae   :  { %967 = vrot.lane.b32.xlu1 %v1888_v11, %s1640_s25  ;;  %973 = vrot.lane.b32.xlu0 %v706_v20, %s1640_s25 }
 0x2af   :  { %857 = vrot.lane.b32.xlu2 %v1920_v44, %s1639_s6  ;;  %1453 = vmatmul.msk.bf16.gmra.mxu2 %vm719_vm6, %v1605_v28 }
 0x2b6   :  { %1083 = vrot.lane.b32.xlu1 %v705_v13, %s1642_s10  ;;  %1023 = vrot.lane.b32.xlu0 %v1888_v11, %s1641_s26 }
 0x2b7   :  { %911 = vrot.lane.b32.xlu2 %v1888_v11, %s1638_s24 }
 0x2be   :  { %1137 = vrot.lane.b32.xlu1 %v1920_v44, %s1643_s27  ;;  %1085 = vrot.lane.b32.xlu0 %v706_v20, %s1642_s10 }
 0x2bf   :  { %971 = vrot.lane.b32.xlu2 %v705_v13, %s1640_s25 }
 0x2c6   :  { %1178 = vperm.xlu1 %1633, %v51_v21   ;;  %1081 = vrot.lane.b32.xlu0 %v1920_v44, %s1642_s10 }
 0x2c7   :  { %1025 = vrot.lane.b32.xlu2 %v1920_v44, %s1641_s26 }
 0x2ce   :  { %1193 = vperm.xlu1 %1633, %v54_v22   ;;  %1135 = vrot.lane.b32.xlu0 %v1888_v11, %s1643_s27 }
 0x2cf   :  { %1141 = vrot.lane.b32.xlu2 %v706_v20, %s1643_s27 }
 0x2d6   :  { %1188 = vperm.xlu0 %1632, %v53_v23  }
 0x2d7   :  { %1139 = vrot.lane.b32.xlu2 %v705_v13, %s1643_s27 }
 0x2df   :  { %1079 = vrot.lane.b32.xlu2 %v1888_v11, %s1642_s10 }
 0x2e7   :  { %1183 = vperm.xlu2 %1634, %v52_v25  }
 0x2e9   :  { %v714_v27 = vpop.permute.xlu2 %713 }
 0x2ea   :  { %730 = vmatpush.bf16.msra.mxu3 %v714_v27 }
 0x2f0   :  { %v804_v29 = vpop.permute.xlu1 %803  ;;  %v712_v30 = vpop.permute.xlu0 %711 }
 0x2f1   :  { %v708_v31 = vpop.permute.xlu2 %707  ;;  %731 = vmatpush.bf16.msra.mxu3 %v712_v30 }
 0x2f5   :  { %732 = vmatpush.bf16.msra.mxu3 %v710_v26 }
 0x2f8   :  { %v916_v11 = vpop.permute.xlu1 %915  ;;  %v860_v32 = vpop.permute.xlu0 %859 }
 0x2f9   :  { %v802_v34 = vpop.permute.xlu2 %801  ;;  %733 = vmatpush.bf16.msra.mxu3 %v708_v31 }
 0x2fc   :  { %1442 = vmatmul.msk.bf16.vlgmr.msra.gmra.mxu3 %vm719_vm6, %v1606_v33 }
 0x300   :  { %v856_v35 = vpop.permute.xlu1 %855  ;;  %v914_v36 = vpop.permute.xlu0 %913 }
 0x301   :  { %v800_v37 = vpop.permute.xlu2 %799 }
 0x308   :  { %v918_v38 = vpop.permute.xlu1 %917  ;;  %v806_v39 = vpop.permute.xlu0 %805 }
 0x309   :  { %v858_v41 = vpop.permute.xlu2 %857  ;;  %821 = vmatpush.bf16.msrb.mxu3 %v806_v39  ;;  %933 = vmatpush.bf16.msra.mxu0 %v918_v38 }
 0x30c   :  { %1443 = vmatmul.msk.bf16.gmra.mxu3 %vm719_vm6, %v1607_v40 }
 0x30d   :  { %822 = vmatpush.bf16.msrb.mxu3 %v804_v29  ;;  %934 = vmatpush.bf16.msra.mxu0 %v916_v11 }
 0x310   :  { %v970_v42 = vpop.permute.xlu1 %969  ;;  %v862_v43 = vpop.permute.xlu0 %861 }
 0x311   :  { %v912_v44 = vpop.permute.xlu2 %911  ;;  %823 = vmatpush.bf16.msrb.mxu3 %v802_v34  ;;  %877 = vmatpush.bf16.msrb.mxu1 %v862_v43 }
 0x312   :  { %935 = vmatpush.bf16.msra.mxu0 %v914_v36 }
 0x315   :  { %824 = vmatpush.bf16.msrb.mxu3 %v800_v37  ;;  %878 = vmatpush.bf16.msrb.mxu1 %v860_v32 }
 0x316   :  { %936 = vmatpush.bf16.msra.mxu0 %v912_v44 }
 0x318   :  { %v1030_v46 = vpop.permute.xlu1 %1029  ;;  %v1028_v47 = vpop.permute.xlu0 %1027 }
 0x319   :  { %v972_v49 = vpop.permute.xlu2 %971  ;;  %879 = vmatpush.bf16.msrb.mxu1 %v858_v41  ;;  %1045 = vmatpush.bf16.msra.mxu3 %v1030_v46 }
 0x31a   :  { %1494 = vmatmul.msk.bf16.vlgmr.msra.gmra.mxu0 %vm719_vm6, %v1612_v45 }
 0x31c   :  { %1466 = vmatmul.msk.bf16.vlgmr.msrb.gmra.mxu3 %vm719_vm6, %v1608_v48 }
 0x31d   :  { %880 = vmatpush.bf16.msrb.mxu1 %v856_v35  ;;  %1046 = vmatpush.bf16.msra.mxu3 %v1028_v47 }
 0x320   :  { %v974_v51 = vpop.permute.xlu0 %973  ;;  %1480 = vmatmul.msk.bf16.vlgmr.msrb.gmra.mxu1 %vm719_vm6, %v1610_v50  ;;  %v968_v52 = vpop.permute.xlu1 %967 }
 0x321   :  { %v1026_v53 = vpop.permute.xlu2 %1025  ;;  %989 = vmatpush.bf16.msrb.mxu2 %v974_v51 }
 0x322   :  { %1047 = vmatpush.bf16.msra.mxu3 %v1026_v53  ;;  %v774_v13 = vpop.f32.mrf.mxu2 }
 0x325   :  { %990 = vmatpush.bf16.msrb.mxu2 %v972_v49 }
 0x328   :  { %v1024_v55 = vpop.permute.xlu0 %1023  ;;  %v1084_v58 = vpop.permute.xlu1 %1083 }
 0x329   :  { %v1142_v57 = vpop.permute.xlu2 %1141  ;;  %991 = vmatpush.bf16.msrb.mxu2 %v970_v42  ;;  %1048 = vmatpush.bf16.msra.mxu3 %v1024_v55 }
 0x32a   :  { %1157 = vmatpush.bf16.msrb.mxu0 %v1142_v57  ;;  %v776_v16 = vpop.f32.mrf.mxu2 }
 0x32b   :  { %1495 = vmatmul.msk.bf16.gmra.mxu0 %vm719_vm6, %v1613_v54 }
 0x32c   :  { %1467 = vmatmul.msk.bf16.gmra.mxu3 %vm719_vm6, %v1609_v56 }
 0x32d   :  { %992 = vmatpush.bf16.msrb.mxu2 %v968_v52 }
 0x330   :  { %v1086_v61 = vpop.permute.xlu0 %1085  ;;  %1508 = vmatmul.msk.bf16.vlgmr.msrb.gmra.mxu2 %vm719_vm6, %v1614_v59  ;;  %1481 = vmatmul.msk.bf16.gmra.mxu1 %vm719_vm6, %v1611_v60  ;;  %v1138_v63 = vpop.permute.xlu1 %1137 }
 0x331   :  { %v1140_v62 = vpop.permute.xlu2 %1139  ;;  %1101 = vmatpush.bf16.msra.mxu1 %v1086_v61 }
 0x332   :  { %1158 = vmatpush.bf16.msrb.mxu0 %v1140_v62  ;;  %v779_v20 = vpop.f32.mrf.mxu2 }
 0x335   :  { %1102 = vmatpush.bf16.msra.mxu1 %v1084_v58 }
 0x336   :  { %1159 = vmatpush.bf16.msrb.mxu0 %v1138_v63 }
 0x338   :  { %v1082_v0 = vpop.permute.xlu0 %1081  ;;  %v1179_v49 = vpop.permute.xlu1 %1178 }
 0x339   :  { %1103 = vmatpush.bf16.msra.mxu1 %v1082_v0  ;;  %v1080_v2 = vpop.permute.xlu2 %1079 }
 0x33a   :  { %v781_v24 = vpop.f32.mrf.mxu2 }
 0x33c   :  { %1522 = vmatmul.msk.bf16.vlgmr.msra.gmra.mxu3 %vm719_vm6, %v1616_v1 }
 0x33d   :  { %1104 = vmatpush.bf16.msra.mxu1 %v1080_v2 }
 0x340   :  { %v1136_v5 = vpop.permute.xlu0 %1135  ;;  %1509 = vmatmul.msk.bf16.gmra.mxu2 %vm719_vm6, %v1615_v3  ;;  %1536 = vmatmul.msk.bf16.vlgmr.msra.gmra.mxu1 %vm719_vm6, %v1618_v4 }
 0x341   :  { %1160 = vmatpush.bf16.msrb.mxu0 %v1136_v5  ;;  %v1184_v0 = vpop.permute.xlu2 %1183 }
 0x344   :  { %1550 = vmatmul.msk.bf16.vlgmr.msrb.gmra.mxu0 %vm719_vm6, %v1620_v6 }
 0x34c   :  { %1523 = vmatmul.msk.bf16.gmra.mxu3 %vm719_vm6, %v1617_v7 }
 0x350   :  { %1537 = vmatmul.msk.bf16.gmra.mxu1 %vm719_vm6, %v1619_v8 }
 0x354   :  { %1551 = vmatmul.msk.bf16.gmra.mxu0 %vm719_vm6, %v1621_v9 }
 0x37f   :  { %v735_v10 = vpop.f32.mrf.mxu3 }
 0x380   :  { %v775_v28 = vadd.f32 %v774_v13, %v735_v10 }
 0x387   :  { %v737_v12 = vpop.f32.mrf.mxu3 }
 0x388   :  { %v777_v34 = vadd.f32 %v776_v16, %v737_v12 }
 0x38f   :  { %v740_v14 = vpop.f32.mrf.mxu3 }
 0x390   :  { %v780_v44 = vadd.f32 %v779_v20, %v740_v14  ;;  %v1189_v14 = vpop.permute.xlu0 %1188 }
 0x397   :  { %v742_v15 = vpop.f32.mrf.mxu3  ;;  %v938_v17 = vpop.f32.mrf.mxu0 }
 0x398   :  { %v782_v59 = vadd.f32 %v781_v24, %v742_v15  ;;  %v1194_v24 = vpop.permute.xlu1 %1193 }
 0x39d   :  { %v882_v18 = vpop.f32.mrf.mxu1 }
 0x39f   :  { %v826_v19 = vpop.f32.mrf.mxu3  ;;  %v940_v22 = vpop.f32.mrf.mxu0 }
 0x3a0   :  { %v836_v29 = vadd.f32 %v826_v19, %v775_v28 }
 0x3a2   :  { %v892_v32 = vadd.f32 %v882_v18, %v836_v29 }
 0x3a4   :  { %v948_v35 = vadd.f32 %v938_v17, %v892_v32 }
 0x3a5   :  { %v884_v21 = vpop.f32.mrf.mxu1 }
 0x3a7   :  { %v828_v23 = vpop.f32.mrf.mxu3 }
 0x3a8   :  { %v943_v27 = vpop.f32.mrf.mxu0  ;;  %v837_v36 = vadd.f32 %v828_v23, %v777_v34 }
 0x3aa   :  { %v893_v41 = vadd.f32 %v884_v21, %v837_v36 }
 0x3ac   :  { %v949_v46 = vadd.f32 %v940_v22, %v893_v41 }
 0x3ad   :  { %v887_v25 = vpop.f32.mrf.mxu1 }
 0x3af   :  { %v831_v26 = vpop.f32.mrf.mxu3 }
 0x3b0   :  { %v945_v33 = vpop.f32.mrf.mxu0  ;;  %v838_v47 = vadd.f32 %v831_v26, %v780_v44 }
 0x3b2   :  { %v894_v54 = vadd.f32 %v887_v25, %v838_v47 }
 0x3b3   :  { %v994_v30 = vpop.f32.mrf.mxu2 }
 0x3b4   :  { %v1004_v38 = vadd.f32 %v994_v30, %v948_v35  ;;  %v950_v61 = vadd.f32 %v943_v27, %v894_v54 }
 0x3b5   :  { %v889_v31 = vpop.f32.mrf.mxu1 }
 0x3b7   :  { %v833_v11 = vpop.f32.mrf.mxu3 }
 0x3b8   :  { %v839_v62 = vadd.f32 %v833_v11, %v782_v59 }
 0x3ba   :  { %v895_v5 = vadd.f32 %v889_v31, %v839_v62 }
 0x3bb   :  { %v996_v39 = vpop.f32.mrf.mxu2 }
 0x3bc   :  { %v1005_v51 = vadd.f32 %v996_v39, %v949_v46  ;;  %v951_v12 = vadd.f32 %v945_v33, %v895_v5 }
 0x3bd   :  { %v1106_v37 = vpop.f32.mrf.mxu1 }
 0x3bf   :  { %v1050_v40 = vpop.f32.mrf.mxu3 }
 0x3c0   :  { %v1060_v42 = vadd.f32 %v1050_v40, %v1004_v38 }
 0x3c1   :  { %v1162_v43 = vpop.f32.mrf.mxu0 }
 0x3c2   :  { %v1116_v45 = vadd.f32 %v1106_v37, %v1060_v42 }
 0x3c3   :  { %v999_v57 = vpop.f32.mrf.mxu2 }
 0x3c4   :  { %v1172_v48 = vadd.f32 %v1162_v43, %v1116_v45  ;;  %v1006_v1 = vadd.f32 %v999_v57, %v950_v61 }
 0x3c5   :  { %v1108_v50 = vpop.f32.mrf.mxu1 }
 0x3c6   :  { %v1196_v52 = vadd.f32 %v1179_v49, %v1172_v48 }
 0x3c7   :  { %v1052_v53 = vpop.f32.mrf.mxu3 }
 0x3c8   :  { %v1200_v55 = vmax.f32 %v1196_v52, 0.0  ;;  %v1061_v56 = vadd.f32 %v1052_v53, %v1005_v51 }
 0x3c9   :  { %v1164_v58 = vpop.f32.mrf.mxu0 }
 0x3ca   :  { %1204 = vst.msk [vmem:[%s2089_s15] sm:$0xff] %vm268_vm1, %v1200_v55  ;;  %v1117_v60 = vadd.f32 %v1108_v50, %v1061_v56  ;;  %1212 = vrot.lane.b32.xlu2 %v1200_v55, %s1644_s9 }
 0x3cb   :  { %v1001_v10 = vpop.f32.mrf.mxu2 }
 0x3cc   :  { %v1173_v63 = vadd.f32 %v1164_v58, %v1117_v60  ;;  %v1007_v15 = vadd.f32 %v1001_v10, %v951_v12 }
 0x3cd   :  { %v1111_v4 = vpop.f32.mrf.mxu1 }
 0x3ce   :  { %v1197_v2 = vadd.f32 %v1184_v0, %v1173_v63 }
 0x3cf   :  { %v1055_v3 = vpop.f32.mrf.mxu3 }
 0x3d0   :  { %v1201_v6 = vmax.f32 %v1197_v2, 0.0  ;;  %v1062_v7 = vadd.f32 %v1055_v3, %v1006_v1 }
 0x3d1   :  { %v1167_v8 = vpop.f32.mrf.mxu0 }
 0x3d2   :  { %1205 = vst.msk [vmem:[%s2089_s15 + $0x8] sm:$0xff] %vm268_vm1, %v1201_v6  ;;  %v1118_v9 = vadd.f32 %v1111_v4, %v1062_v7  ;;  %1214 = vrot.lane.b32.xlu0 %v1201_v6, %s1644_s9 }
 0x3d4   :  { %v1174_v13 = vadd.f32 %v1167_v8, %v1118_v9 }
 0x3d5   :  { %v1113_v20 = vpop.f32.mrf.mxu1 }
 0x3d6   :  { %v1198_v16 = vadd.f32 %v1189_v14, %v1174_v13 }
 0x3d7   :  { %v1057_v17 = vpop.f32.mrf.mxu3 }
 0x3d8   :  { %v1202_v18 = vmax.f32 %v1198_v16, 0.0  ;;  %v1063_v19 = vadd.f32 %v1057_v17, %v1007_v15 }
 0x3d9   :  { %v1169_v22 = vpop.f32.mrf.mxu0 }
 0x3da   :  { %1206 = vst.msk [vmem:[%s2089_s15 + $0x10] sm:$0xff] %vm268_vm1, %v1202_v18  ;;  %v1119_v21 = vadd.f32 %v1113_v20, %v1063_v19  ;;  %1216 = vrot.lane.b32.xlu1 %v1202_v18, %s1644_s9 }
 0x3dc   :  { %v1175_v23 = vadd.f32 %v1169_v22, %v1119_v21 }
 0x3de   :  { %v1199_v25 = vadd.f32 %v1194_v24, %v1175_v23 }
 0x3e0   :  { %v1203_v26 = vmax.f32 %v1199_v25, 0.0 }
 0x3e2   :  { %1207 = vst.msk [vmem:[%s2089_s15 + $0x18] sm:$0xff] %vm268_vm1, %v1203_v26  ;;  %1218 = vrot.lane.b32.xlu2 %v1203_v26, %s1644_s9 }
 0x424   :  { %v1213_v27 = vpop.permute.xlu2 %1212 }
 0x425   :  { %1552 = vst.msk [vmem:[%s2089_s15 + $0x20] sm:$0xff] %vm268_vm1, %v1213_v27 }
 0x43c   :  { %v1219_v28 = vpop.permute.xlu2 %1218 }
 0x43d   :  { %1555 = vst.msk [vmem:[%s2089_s15 + $0x38] sm:$0xff] %vm268_vm1, %v1219_v28 }
 0x444   :  { %v1215_v29 = vpop.permute.xlu0 %1214 }
 0x445   :  { %1553 = vst.msk [vmem:[%s2089_s15 + $0x28] sm:$0xff] %vm268_vm1, %v1215_v29 }
 0x44c   :  { %v1217_v30 = vpop.permute.xlu1 %1216 }
 0x44d   :  { %1554 = vst.msk [vmem:[%s2089_s15 + $0x30] sm:$0xff] %vm268_vm1, %v1217_v30 }

</bundles_post_ra>
